<compile_context>
chip_gen: v5e
topology: v5e:2x2
jax: 0.10.0
libtpu: 0.0.40
codegen_flags: <defaults>
</compile_context>

<pallas_src>
import functools
import itertools

import jax
import jax.numpy as jnp
import numpy as np
from jax.experimental import pallas as pl
from jax.experimental.pallas import tpu as pltpu

ALPHA = 0.25      # focal loss alpha
GAMMA = 2.0       # focal loss gamma (== 2 -> p*p)
EPS_AREA = 1e-7   # guard for box-area / union denominators


def _round_up(x, m):
    return ((x + m - 1) // m) * m


def _refined_recip(x):
    """EUP approximate reciprocal + one Newton step (near-f32 accurate)."""
    y = pl.reciprocal(x, approx=True)
    return y * (2.0 - x * y)


def _cost_kernel(logits_ref, obox_ref, onehot_ref, tboxT_ref, c_ref, *,
                 cost_class_w, cost_bbox_w, cost_giou_w, pre_gather):
    onehot = onehot_ref[...]                       # (C, Tpad), exact {0, 1}

    def focal(x):
        # Stable shared-exp sigmoid + softplus:
        #   e = exp(-|x|); sigmoid(x) = 1/(1+e) (x>=0) or e/(1+e) (x<0)
        #   -log(sigmoid(x))   = max(-x, 0) + log(1+e)
        #   -log(1-sigmoid(x)) = x + (-log(sigmoid(x)))
        e = jnp.exp(-jnp.abs(x))
        den = 1.0 + e
        inv = _refined_recip(den)
        prob = jnp.where(x >= 0.0, inv, e * inv)
        nlog_p = jnp.maximum(-x, 0.0) + jnp.log(den)
        nlog_1mp = x + nlog_p
        one_m = 1.0 - prob
        # cost_class weight folded into the focal constants.
        pos = (cost_class_w * ALPHA) * (one_m * one_m) * nlog_p
        neg = (cost_class_w * (1.0 - ALPHA)) * (prob * prob) * nlog_1mp
        return pos - neg

    if pre_gather:
        # Focal math on the (TILE_N, C) block, then gather the finished cost
        # with the one-hot matmul: transcendental/VALU work scales with C.
        cls_cost = focal(logits_ref[...])                           # (TILE_N, C)
        acc = jnp.dot(cls_cost, onehot,
                      preferred_element_type=jnp.float32)           # (TILE_N, Tpad)
    else:
        # C > Tpad: gather per-target logits first, focal on (TILE_N, Tpad).
        sel = jnp.dot(logits_ref[...], onehot,
                      preferred_element_type=jnp.float32)
        acc = focal(sel)

    ob = obox_ref[...]                              # (TILE_N, 4) cxcywh
    tb = tboxT_ref[...]                             # (4, Tpad)   cxcywh
    ocx, ocy, ow, oh = ob[:, 0:1], ob[:, 1:2], ob[:, 2:3], ob[:, 3:4]
    tcx, tcy, tw, th = tb[0:1, :], tb[1:2, :], tb[2:3, :], tb[3:4, :]

    # ----- L1 cdist between boxes (cxcywh space), weighted -----
    acc = acc + cost_bbox_w * (jnp.abs(ocx - tcx) + jnp.abs(ocy - tcy)
                               + jnp.abs(ow - tw) + jnp.abs(oh - th))

    # ----- pairwise generalized IoU (cxcywh -> xyxy) -----
    ox0, oy0 = ocx - 0.5 * ow, ocy - 0.5 * oh
    ox1, oy1 = ocx + 0.5 * ow, ocy + 0.5 * oh
    tx0, ty0 = tcx - 0.5 * tw, tcy - 0.5 * th
    tx1, ty1 = tcx + 0.5 * tw, tcy + 0.5 * th

    area_o = (ox1 - ox0) * (oy1 - oy0)              # (TILE_N, 1)
    area_t = (tx1 - tx0) * (ty1 - ty0)              # (1, Tpad)

    # Intersection: consume iw/ih immediately (tight live ranges).
    inter = (jnp.maximum(jnp.minimum(ox1, tx1) - jnp.maximum(ox0, tx0), 0.0)
             * jnp.maximum(jnp.minimum(oy1, ty1) - jnp.maximum(oy0, ty0), 0.0))
    union = area_o + area_t - inter
    iou = inter * _refined_recip(jnp.maximum(union, EPS_AREA))

    # Enclosing box area (ew/eh consumed immediately).
    earea = (jnp.maximum(jnp.maximum(ox1, tx1) - jnp.minimum(ox0, tx0), 0.0)
             * jnp.maximum(jnp.maximum(oy1, ty1) - jnp.minimum(oy0, ty0), 0.0))
    giou = iou - (earea - union) * _refined_recip(jnp.maximum(earea, EPS_AREA))

    acc = acc - cost_giou_w * giou
    c_ref[...] = acc.astype(c_ref.dtype)


def compute_cost_matrix_padded(pred_logits, pred_boxes, tgt_ids, tgt_boxes,
                               cost_class=1.0, cost_bbox=1.0, cost_giou=1.0,
                               tile_n=512, t_bucket=None):
    """Returns (C_padded (n_pad, t_pad) f32 device array, n, t).

    Slice [:n, :t] on the host (it goes to host for the assignment anyway).
    """
    bs, nq, num_classes = pred_logits.shape
    n = bs * nq
    t = int(tgt_ids.shape[0])

    # Lane-dense (multiple of 128) target axis.  Pass a fixed t_bucket
    # (e.g. model max targets) in production to keep one compiled artifact.
    t_real = max(t, 1)
    if t_bucket is not None:
        t_pad = max(128, _round_up(int(t_bucket), 128))
    else:
        t_pad = max(128, _round_up(t_real, 128))

    # Cap the (tile_n, t_pad) tile so ~15 live f32 (tile_n, t_pad)
    # temporaries + double-buffered output stay inside v7x's smaller VMEM.
    while tile_n > 64 and tile_n * t_pad > 512 * 512:
        tile_n //= 2
    if n <= tile_n:
        tile_n = max(8, _round_up(n, 8))
    n_pad = _round_up(n, tile_n)
    grid_n = n_pad // tile_n
    # Even grid length so the "parallel" axis splits evenly across a v7x
    # megacore's two TensorCores.
    if grid_n > 1 and grid_n % 2 == 1 and tile_n % 16 == 0:
        tile_n //= 2
        grid_n *= 2

    logits = pred_logits.reshape(n, num_classes).astype(jnp.float32)
    obox = pred_boxes.reshape(n, 4).astype(jnp.float32)
    if n_pad > n:
        logits = jnp.pad(logits, ((0, n_pad - n), (0, 0)))
        dummy = jnp.tile(jnp.array([[0.5, 0.5, 1.0, 1.0]], jnp.float32),
                         (n_pad - n, 1))
        obox = jnp.concatenate([obox, dummy], axis=0)

    # Padded target ids use an out-of-range class -> all-zero one-hot column.
    ids_pad = jnp.full((t_pad,), num_classes, dtype=jnp.int32)
    if t > 0:
        ids_pad = ids_pad.at[:t].set(tgt_ids.astype(jnp.int32))
    onehot = jax.nn.one_hot(ids_pad, num_classes, dtype=jnp.float32).T  # (C, Tpad)

    # Padded target boxes are valid unit boxes (non-zero area -> no 0/0).
    tb_pad = jnp.tile(jnp.array([[0.5, 0.5, 1.0, 1.0]], jnp.float32), (t_pad, 1))
    if t > 0:
        tb_pad = tb_pad.at[:t, :].set(tgt_boxes.astype(jnp.float32))
    tboxT = tb_pad.T                                                    # (4, Tpad)

    kernel = functools.partial(
        _cost_kernel,
        cost_class_w=float(cost_class),
        cost_bbox_w=float(cost_bbox),
        cost_giou_w=float(cost_giou),
        pre_gather=(num_classes <= t_pad))   # trace-time order choice

    c_pad = pl.pallas_call(
        kernel,
        out_shape=jax.ShapeDtypeStruct((n_pad, t_pad), jnp.float32),
        grid=(grid_n,),
        in_specs=[
            pl.BlockSpec((tile_n, num_classes), lambda i: (i, 0)),   # logits tile
            pl.BlockSpec((tile_n, 4), lambda i: (i, 0)),             # pred boxes tile
            pl.BlockSpec((num_classes, t_pad), lambda i: (0, 0)),    # one-hot (whole)
            pl.BlockSpec((4, t_pad), lambda i: (0, 0)),              # tgt boxes (whole)
        ],
        out_specs=pl.BlockSpec((tile_n, t_pad), lambda i: (i, 0)),
        compiler_params=pltpu.CompilerParams(
            dimension_semantics=("parallel",)),
    )(logits, obox, onehot, tboxT)

    return c_pad, n, t


def _linear_sum_assignment(cost):
    """Minimum-cost bipartite matching (Jonker-Volgenant style shortest
    augmenting path).  Equivalent to scipy.optimize.linear_sum_assignment;
    handles rectangular matrices, returns (row_ind, col_ind) sorted by row."""
    cost = np.asarray(cost, dtype=np.float64)
    transposed = cost.shape[0] > cost.shape[1]
    if transposed:
        cost = cost.T
    n, m = cost.shape                       # n <= m; match every row
    if n == 0:
        empty = np.zeros((0,), dtype=np.int64)
        return empty, empty
    INF = np.inf
    u = np.zeros(n + 1)
    v = np.zeros(m + 1)
    p = np.zeros(m + 1, dtype=np.int64)     # p[j]: row matched to col j (1-based)
    way = np.zeros(m + 1, dtype=np.int64)
    for i in range(1, n + 1):
        p[0] = i
        j0 = 0
        minv = np.full(m + 1, INF)
        used = np.zeros(m + 1, dtype=bool)
        while True:
            used[j0] = True
            i0 = p[j0]
            cur = cost[i0 - 1, :] - u[i0] - v[1:]
            upd = (~used[1:]) & (cur < minv[1:])
            minv[1:] = np.where(upd, cur, minv[1:])
            way[1:] = np.where(upd, j0, way[1:])
            cand = np.where(used[1:], INF, minv[1:])
            j1 = int(np.argmin(cand)) + 1
            delta = cand[j1 - 1]
            used_idx = np.flatnonzero(used)
            u[p[used_idx]] += delta
            v[used_idx] -= delta
            minv[~used] -= delta
            j0 = j1
            if p[j0] == 0:
                break
        while True:
            j1 = way[j0]
            p[j0] = p[j1]
            j0 = j1
            if j0 == 0:
                break
    rows, cols = [], []
    for j in range(1, m + 1):
        if p[j] != 0:
            rows.append(p[j] - 1)
            cols.append(j - 1)
    rows = np.asarray(rows, dtype=np.int64)
    cols = np.asarray(cols, dtype=np.int64)
    if transposed:
        rows, cols = cols, rows
    order = np.argsort(rows)
    return rows[order], cols[order]


def hungarian_matcher(outputs, targets, cost_class=1.0, cost_bbox=1.0,
                      cost_giou=1.0):
    bs, nq = outputs["pred_logits"].shape[:2]
    tgt_ids = jnp.concatenate([v["labels"] for v in targets])
    tgt_boxes = jnp.concatenate([v["boxes"] for v in targets])
    c_pad, n, t = compute_cost_matrix_padded(
        outputs["pred_logits"], outputs["pred_boxes"], tgt_ids, tgt_boxes,
        cost_class=cost_class, cost_bbox=cost_bbox, cost_giou=cost_giou)
    # Full padded matrix comes back; slicing in numpy on host is free and
    # avoids an extra on-device copy before the D2H transfer.
    c_pad_host = np.asarray(jax.block_until_ready(c_pad))
    c_host = c_pad_host[:n, :t].reshape(bs, nq, t)
    sizes = [int(v["boxes"].shape[0]) for v in targets]
    indices = []
    off = 0
    for i, sz in enumerate(sizes):
        if sz == 0:
            indices.append((np.zeros((0,), np.int64), np.zeros((0,), np.int64)))
        else:
            indices.append(_linear_sum_assignment(c_host[i, :, off:off + sz]))
        off += sz
    return indices, c_host


def _reference_cost(logits, boxes, tgt_ids, tgt_boxes, wc, wb, wg):
    """Pure numpy reference mirroring the PyTorch forward (focal mode)."""
    eps = 1e-8
    prob = 1.0 / (1.0 + np.exp(-logits))
    neg = (1 - ALPHA) * (prob ** 2) * (-np.log(1 - prob + eps))
    pos = ALPHA * ((1 - prob) ** 2) * (-np.log(prob + eps))
    cost_class = pos[:, tgt_ids] - neg[:, tgt_ids]
    cost_bbox = np.abs(boxes[:, None, :] - tgt_boxes[None, :, :]).sum(-1)

    def to_xyxy(b):
        cx, cy, w, h = b[:, 0], b[:, 1], b[:, 2], b[:, 3]
        return np.stack([cx - 0.5 * w, cy - 0.5 * h,
                         cx + 0.5 * w, cy + 0.5 * h], -1)

    b1, b2 = to_xyxy(boxes), to_xyxy(tgt_boxes)
    a1 = (b1[:, 2] - b1[:, 0]) * (b1[:, 3] - b1[:, 1])
    a2 = (b2[:, 2] - b2[:, 0]) * (b2[:, 3] - b2[:, 1])
    lt = np.maximum(b1[:, None, :2], b2[None, :, :2])
    rb = np.minimum(b1[:, None, 2:], b2[None, :, 2:])
    wh = np.clip(rb - lt, 0, None)
    inter = wh[..., 0] * wh[..., 1]
    union = a1[:, None] + a2[None, :] - inter
    iou = inter / union
    elt = np.minimum(b1[:, None, :2], b2[None, :, :2])
    erb = np.maximum(b1[:, None, 2:], b2[None, :, 2:])
    ewh = np.clip(erb - elt, 0, None)
    earea = ewh[..., 0] * ewh[..., 1]
    giou = iou - (earea - union) / earea
    return wb * cost_bbox + wc * cost_class + wg * (-giou)


if __name__ == "__main__":
    key = jax.random.PRNGKey(0)
    bs, num_queries, num_classes = 2, 8, 32
    sizes = [3, 3]

    k1, k2, k3, k4, k5 = jax.random.split(key, 5)
    pred_logits = jax.random.normal(k1, (bs, num_queries, num_classes),
                                    dtype=jnp.float32)
    centers = jax.random.uniform(k2, (bs, num_queries, 2), minval=0.2, maxval=0.8)
    whs = jax.random.uniform(k3, (bs, num_queries, 2), minval=0.1, maxval=0.4)
    pred_boxes = jnp.concatenate([centers, whs], -1)

    targets = []
    tks = jax.random.split(k4, len(sizes))
    bks = jax.random.split(k5, len(sizes))
    for i, sz in enumerate(sizes):
        labels = jax.random.randint(tks[i], (sz,), 0, num_classes)
        tc = jax.random.uniform(bks[i], (sz, 2), minval=0.2, maxval=0.8)
        tw = jax.random.uniform(jax.random.fold_in(bks[i], 1), (sz, 2),
                                minval=0.1, maxval=0.4)
        targets.append({"labels": labels,
                        "boxes": jnp.concatenate([tc, tw], -1)})

    outputs = {"pred_logits": pred_logits, "pred_boxes": pred_boxes}
    indices, c_host = hungarian_matcher(outputs, targets,
                                        cost_class=1.0, cost_bbox=1.0,
                                        cost_giou=1.0)

    # --- correctness check against a numpy reference of the torch math ---
    logits_np = np.asarray(pred_logits).reshape(-1, num_classes)
    boxes_np = np.asarray(pred_boxes).reshape(-1, 4)
    tgt_ids_np = np.concatenate([np.asarray(v["labels"]) for v in targets])
    tgt_boxes_np = np.concatenate([np.asarray(v["boxes"]) for v in targets])
    c_ref = _reference_cost(logits_np.astype(np.float32),
                            boxes_np.astype(np.float32),
                            tgt_ids_np, tgt_boxes_np.astype(np.float32),
                            1.0, 1.0, 1.0).reshape(bs, num_queries, -1)
    # Tolerance covers the MXU one-hot-gather matmul pass precision; the
    # Newton-refined reciprocals keep the rest near exact f32.
    assert np.max(np.abs(c_host - c_ref)) < 2e-2, np.max(np.abs(c_host - c_ref))
    assert np.all(np.isfinite(c_host))

    # --- assignment check: each image gets min(q, t) matches and the total
    #     cost (under the reference matrix) is optimal (brute-force check). ---
    off = 0
    for i, ((ri, ci), sz) in enumerate(zip(indices, sizes)):
        assert len(ri) == len(ci) == min(num_queries, sz)
        sub_ref = c_ref[i, :, off:off + sz]
        best = min(sum(sub_ref[list(rows), list(range(sz))])
                   for rows in itertools.permutations(range(num_queries), sz))
        got = float(sub_ref[ri, ci].sum())
        assert got <= best + 1e-2, (got, best)
        off += sz

    print("KERNEL_OK")
</pallas_src>

<mosaic_0001>
module attributes {stable_mosaic.version = 11 : i64} {
  func.func @_cost_kernel(%arg0: i32, %arg1: memref<16x32xf32, #tpu.memory_space<vmem>>, %arg2: memref<16x4xf32, #tpu.memory_space<vmem>>, %arg3: memref<32x128xf32, #tpu.memory_space<vmem>>, %arg4: memref<4x128xf32, #tpu.memory_space<vmem>>, %arg5: memref<16x128xf32, #tpu.memory_space<vmem>>) attributes {dimension_semantics = [#tpu.dimension_semantics<parallel>], iteration_bounds = array<i64: 1>, scalar_prefetch = 0 : i64, scratch_operands = 0 : i64, tpu.core_type = #tpu.core_type<tc>, window_params = [{transform_indices = @transform_0, window_bounds = array<i64: 16, 32>}, {transform_indices = @transform_1, window_bounds = array<i64: 16, 4>}, {pipeline_mode = #tpu.pipeline_mode<synchronous>, transform_indices = @transform_2, window_bounds = array<i64: 32, 128>}, {pipeline_mode = #tpu.pipeline_mode<synchronous>, transform_indices = @transform_3, window_bounds = array<i64: 4, 128>}, {transform_indices = @transform_4, window_bounds = array<i64: 16, 128>}]} {
    %c0 = arith.constant 0 : index
    %c0_0 = arith.constant 0 : index
    %0 = vector.load %arg3[%c0, %c0_0] : memref<32x128xf32, #tpu.memory_space<vmem>>, vector<32x128xf32>
    %c0_1 = arith.constant 0 : index
    %c0_2 = arith.constant 0 : index
    %1 = vector.load %arg1[%c0_1, %c0_2] : memref<16x32xf32, #tpu.memory_space<vmem>>, vector<16x32xf32>
    %2 = math.absf %1 : vector<16x32xf32>
    %cst = arith.constant 0.000000e+00 : f32
    %3 = vector.broadcast %cst : f32 to vector<16x32xf32>
    %4 = arith.subf %3, %2 : vector<16x32xf32>
    %5 = math.exp %4 : vector<16x32xf32>
    %cst_3 = arith.constant 1.000000e+00 : f32
    %6 = vector.broadcast %cst_3 : f32 to vector<16x32xf32>
    %7 = arith.addf %6, %5 : vector<16x32xf32>
    %8 = tpu.reciprocal %7 {approx = true} : vector<16x32xf32> -> vector<16x32xf32>
    %9 = arith.mulf %7, %8 : vector<16x32xf32>
    %cst_4 = arith.constant 2.000000e+00 : f32
    %10 = vector.broadcast %cst_4 : f32 to vector<16x32xf32>
    %11 = arith.subf %10, %9 : vector<16x32xf32>
    %12 = arith.mulf %8, %11 : vector<16x32xf32>
    %cst_5 = arith.constant 0.000000e+00 : f32
    %13 = vector.broadcast %cst_5 : f32 to vector<16x32xf32>
    %14 = arith.cmpf oge, %1, %13 : vector<16x32xf32>
    %15 = arith.mulf %5, %12 : vector<16x32xf32>
    %16 = arith.select %14, %12, %15 : vector<16x32xi1>, vector<16x32xf32>
    %cst_6 = arith.constant 0.000000e+00 : f32
    %17 = vector.broadcast %cst_6 : f32 to vector<16x32xf32>
    %18 = arith.subf %17, %1 : vector<16x32xf32>
    %cst_7 = arith.constant 0.000000e+00 : f32
    %19 = vector.broadcast %cst_7 : f32 to vector<16x32xf32>
    %20 = arith.maximumf %18, %19 : vector<16x32xf32>
    %21 = math.log %7 : vector<16x32xf32>
    %22 = arith.addf %20, %21 : vector<16x32xf32>
    %23 = arith.addf %1, %22 : vector<16x32xf32>
    %cst_8 = arith.constant 1.000000e+00 : f32
    %24 = vector.broadcast %cst_8 : f32 to vector<16x32xf32>
    %25 = arith.subf %24, %16 : vector<16x32xf32>
    %26 = arith.mulf %25, %25 : vector<16x32xf32>
    %cst_9 = arith.constant 2.500000e-01 : f32
    %27 = vector.broadcast %cst_9 : f32 to vector<16x32xf32>
    %28 = arith.mulf %27, %26 : vector<16x32xf32>
    %29 = arith.mulf %28, %22 : vector<16x32xf32>
    %30 = arith.mulf %16, %16 : vector<16x32xf32>
    %cst_10 = arith.constant 7.500000e-01 : f32
    %31 = vector.broadcast %cst_10 : f32 to vector<16x32xf32>
    %32 = arith.mulf %31, %30 : vector<16x32xf32>
    %33 = arith.mulf %32, %23 : vector<16x32xf32>
    %34 = arith.subf %29, %33 : vector<16x32xf32>
    %cst_11 = arith.constant dense<0.000000e+00> : vector<16x128xf32>
    %35 = tpu.matmul %34, %0, %cst_11 {dimension_numbers = #tpu.dot_dimension_numbers<[1], [0], [0], [1], [0, 0, 1, 1], [], []>} : vector<16x32xf32>, vector<32x128xf32>, vector<16x128xf32> -> vector<16x128xf32>
    %c0_12 = arith.constant 0 : index
    %c0_13 = arith.constant 0 : index
    %36 = vector.load %arg2[%c0_12, %c0_13] : memref<16x4xf32, #tpu.memory_space<vmem>>, vector<16x4xf32>
    %c0_14 = arith.constant 0 : index
    %c0_15 = arith.constant 0 : index
    %37 = vector.load %arg4[%c0_14, %c0_15] : memref<4x128xf32, #tpu.memory_space<vmem>>, vector<4x128xf32>
    %38 = vector.extract_strided_slice %36 {offsets = [0, 0], sizes = [16, 1], strides = [1, 1]} : vector<16x4xf32> to vector<16x1xf32>
    %39 = vector.extract_strided_slice %36 {offsets = [0, 1], sizes = [16, 1], strides = [1, 1]} : vector<16x4xf32> to vector<16x1xf32>
    %40 = vector.extract_strided_slice %36 {offsets = [0, 2], sizes = [16, 1], strides = [1, 1]} : vector<16x4xf32> to vector<16x1xf32>
    %41 = vector.extract_strided_slice %36 {offsets = [0, 3], sizes = [16, 1], strides = [1, 1]} : vector<16x4xf32> to vector<16x1xf32>
    %42 = vector.extract_strided_slice %37 {offsets = [0, 0], sizes = [1, 128], strides = [1, 1]} : vector<4x128xf32> to vector<1x128xf32>
    %43 = vector.extract_strided_slice %37 {offsets = [1, 0], sizes = [1, 128], strides = [1, 1]} : vector<4x128xf32> to vector<1x128xf32>
    %44 = vector.extract_strided_slice %37 {offsets = [2, 0], sizes = [1, 128], strides = [1, 1]} : vector<4x128xf32> to vector<1x128xf32>
    %45 = vector.extract_strided_slice %37 {offsets = [3, 0], sizes = [1, 128], strides = [1, 1]} : vector<4x128xf32> to vector<1x128xf32>
    %46 = vector.broadcast %38 : vector<16x1xf32> to vector<16x128xf32>
    %47 = vector.broadcast %42 : vector<1x128xf32> to vector<16x128xf32>
    %48 = arith.subf %46, %47 : vector<16x128xf32>
    %49 = math.absf %48 : vector<16x128xf32>
    %50 = vector.broadcast %39 : vector<16x1xf32> to vector<16x128xf32>
    %51 = vector.broadcast %43 : vector<1x128xf32> to vector<16x128xf32>
    %52 = arith.subf %50, %51 : vector<16x128xf32>
    %53 = math.absf %52 : vector<16x128xf32>
    %54 = arith.addf %49, %53 : vector<16x128xf32>
    %55 = vector.broadcast %40 : vector<16x1xf32> to vector<16x128xf32>
    %56 = vector.broadcast %44 : vector<1x128xf32> to vector<16x128xf32>
    %57 = arith.subf %55, %56 : vector<16x128xf32>
    %58 = math.absf %57 : vector<16x128xf32>
    %59 = arith.addf %54, %58 : vector<16x128xf32>
    %60 = vector.broadcast %41 : vector<16x1xf32> to vector<16x128xf32>
    %61 = vector.broadcast %45 : vector<1x128xf32> to vector<16x128xf32>
    %62 = arith.subf %60, %61 : vector<16x128xf32>
    %63 = math.absf %62 : vector<16x128xf32>
    %64 = arith.addf %59, %63 : vector<16x128xf32>
    %cst_16 = arith.constant 1.000000e+00 : f32
    %65 = vector.broadcast %cst_16 : f32 to vector<16x128xf32>
    %66 = arith.mulf %65, %64 : vector<16x128xf32>
    %67 = arith.addf %35, %66 : vector<16x128xf32>
    %cst_17 = arith.constant 5.000000e-01 : f32
    %68 = vector.broadcast %cst_17 : f32 to vector<16x1xf32>
    %69 = arith.mulf %68, %40 : vector<16x1xf32>
    %70 = arith.subf %38, %69 : vector<16x1xf32>
    %cst_18 = arith.constant 5.000000e-01 : f32
    %71 = vector.broadcast %cst_18 : f32 to vector<16x1xf32>
    %72 = arith.mulf %71, %41 : vector<16x1xf32>
    %73 = arith.subf %39, %72 : vector<16x1xf32>
    %cst_19 = arith.constant 5.000000e-01 : f32
    %74 = vector.broadcast %cst_19 : f32 to vector<16x1xf32>
    %75 = arith.mulf %74, %40 : vector<16x1xf32>
    %76 = arith.addf %38, %75 : vector<16x1xf32>
    %cst_20 = arith.constant 5.000000e-01 : f32
    %77 = vector.broadcast %cst_20 : f32 to vector<16x1xf32>
    %78 = arith.mulf %77, %41 : vector<16x1xf32>
    %79 = arith.addf %39, %78 : vector<16x1xf32>
    %cst_21 = arith.constant 5.000000e-01 : f32
    %80 = vector.broadcast %cst_21 : f32 to vector<1x128xf32>
    %81 = arith.mulf %80, %44 : vector<1x128xf32>
    %82 = arith.subf %42, %81 : vector<1x128xf32>
    %cst_22 = arith.constant 5.000000e-01 : f32
    %83 = vector.broadcast %cst_22 : f32 to vector<1x128xf32>
    %84 = arith.mulf %83, %45 : vector<1x128xf32>
    %85 = arith.subf %43, %84 : vector<1x128xf32>
    %cst_23 = arith.constant 5.000000e-01 : f32
    %86 = vector.broadcast %cst_23 : f32 to vector<1x128xf32>
    %87 = arith.mulf %86, %44 : vector<1x128xf32>
    %88 = arith.addf %42, %87 : vector<1x128xf32>
    %cst_24 = arith.constant 5.000000e-01 : f32
    %89 = vector.broadcast %cst_24 : f32 to vector<1x128xf32>
    %90 = arith.mulf %89, %45 : vector<1x128xf32>
    %91 = arith.addf %43, %90 : vector<1x128xf32>
    %92 = arith.subf %76, %70 : vector<16x1xf32>
    %93 = arith.subf %79, %73 : vector<16x1xf32>
    %94 = arith.mulf %92, %93 : vector<16x1xf32>
    %95 = arith.subf %88, %82 : vector<1x128xf32>
    %96 = arith.subf %91, %85 : vector<1x128xf32>
    %97 = arith.mulf %95, %96 : vector<1x128xf32>
    %98 = vector.broadcast %76 : vector<16x1xf32> to vector<16x128xf32>
    %99 = vector.broadcast %88 : vector<1x128xf32> to vector<16x128xf32>
    %100 = arith.minimumf %98, %99 : vector<16x128xf32>
    %101 = vector.broadcast %70 : vector<16x1xf32> to vector<16x128xf32>
    %102 = vector.broadcast %82 : vector<1x128xf32> to vector<16x128xf32>
    %103 = arith.maximumf %101, %102 : vector<16x128xf32>
    %104 = arith.subf %100, %103 : vector<16x128xf32>
    %cst_25 = arith.constant 0.000000e+00 : f32
    %105 = vector.broadcast %cst_25 : f32 to vector<16x128xf32>
    %106 = arith.maximumf %104, %105 : vector<16x128xf32>
    %107 = vector.broadcast %79 : vector<16x1xf32> to vector<16x128xf32>
    %108 = vector.broadcast %91 : vector<1x128xf32> to vector<16x128xf32>
    %109 = arith.minimumf %107, %108 : vector<16x128xf32>
    %110 = vector.broadcast %73 : vector<16x1xf32> to vector<16x128xf32>
    %111 = vector.broadcast %85 : vector<1x128xf32> to vector<16x128xf32>
    %112 = arith.maximumf %110, %111 : vector<16x128xf32>
    %113 = arith.subf %109, %112 : vector<16x128xf32>
    %cst_26 = arith.constant 0.000000e+00 : f32
    %114 = vector.broadcast %cst_26 : f32 to vector<16x128xf32>
    %115 = arith.maximumf %113, %114 : vector<16x128xf32>
    %116 = arith.mulf %106, %115 : vector<16x128xf32>
    %117 = vector.broadcast %94 : vector<16x1xf32> to vector<16x128xf32>
    %118 = vector.broadcast %97 : vector<1x128xf32> to vector<16x128xf32>
    %119 = arith.addf %117, %118 : vector<16x128xf32>
    %120 = arith.subf %119, %116 : vector<16x128xf32>
    %cst_27 = arith.constant 1.000000e-07 : f32
    %121 = vector.broadcast %cst_27 : f32 to vector<16x128xf32>
    %122 = arith.maximumf %120, %121 : vector<16x128xf32>
    %123 = tpu.reciprocal %122 {approx = true} : vector<16x128xf32> -> vector<16x128xf32>
    %124 = arith.mulf %122, %123 : vector<16x128xf32>
    %cst_28 = arith.constant 2.000000e+00 : f32
    %125 = vector.broadcast %cst_28 : f32 to vector<16x128xf32>
    %126 = arith.subf %125, %124 : vector<16x128xf32>
    %127 = arith.mulf %123, %126 : vector<16x128xf32>
    %128 = arith.mulf %116, %127 : vector<16x128xf32>
    %129 = vector.broadcast %76 : vector<16x1xf32> to vector<16x128xf32>
    %130 = vector.broadcast %88 : vector<1x128xf32> to vector<16x128xf32>
    %131 = arith.maximumf %129, %130 : vector<16x128xf32>
    %132 = vector.broadcast %70 : vector<16x1xf32> to vector<16x128xf32>
    %133 = vector.broadcast %82 : vector<1x128xf32> to vector<16x128xf32>
    %134 = arith.minimumf %132, %133 : vector<16x128xf32>
    %135 = arith.subf %131, %134 : vector<16x128xf32>
    %cst_29 = arith.constant 0.000000e+00 : f32
    %136 = vector.broadcast %cst_29 : f32 to vector<16x128xf32>
    %137 = arith.maximumf %135, %136 : vector<16x128xf32>
    %138 = vector.broadcast %79 : vector<16x1xf32> to vector<16x128xf32>
    %139 = vector.broadcast %91 : vector<1x128xf32> to vector<16x128xf32>
    %140 = arith.maximumf %138, %139 : vector<16x128xf32>
    %141 = vector.broadcast %73 : vector<16x1xf32> to vector<16x128xf32>
    %142 = vector.broadcast %85 : vector<1x128xf32> to vector<16x128xf32>
    %143 = arith.minimumf %141, %142 : vector<16x128xf32>
    %144 = arith.subf %140, %143 : vector<16x128xf32>
    %cst_30 = arith.constant 0.000000e+00 : f32
    %145 = vector.broadcast %cst_30 : f32 to vector<16x128xf32>
    %146 = arith.maximumf %144, %145 : vector<16x128xf32>
    %147 = arith.mulf %137, %146 : vector<16x128xf32>
    %148 = arith.subf %147, %120 : vector<16x128xf32>
    %cst_31 = arith.constant 1.000000e-07 : f32
    %149 = vector.broadcast %cst_31 : f32 to vector<16x128xf32>
    %150 = arith.maximumf %147, %149 : vector<16x128xf32>
    %151 = tpu.reciprocal %150 {approx = true} : vector<16x128xf32> -> vector<16x128xf32>
    %152 = arith.mulf %150, %151 : vector<16x128xf32>
    %cst_32 = arith.constant 2.000000e+00 : f32
    %153 = vector.broadcast %cst_32 : f32 to vector<16x128xf32>
    %154 = arith.subf %153, %152 : vector<16x128xf32>
    %155 = arith.mulf %151, %154 : vector<16x128xf32>
    %156 = arith.mulf %148, %155 : vector<16x128xf32>
    %157 = arith.subf %128, %156 : vector<16x128xf32>
    %cst_33 = arith.constant 1.000000e+00 : f32
    %158 = vector.broadcast %cst_33 : f32 to vector<16x128xf32>
    %159 = arith.mulf %158, %157 : vector<16x128xf32>
    %160 = arith.subf %67, %159 : vector<16x128xf32>
    %c0_34 = arith.constant 0 : index
    %c0_35 = arith.constant 0 : index
    %161 = vector.load %arg5[%c0_34, %c0_35] : memref<16x128xf32, #tpu.memory_space<vmem>>, vector<16x128xf32>
    tpu.vector_store %arg5[%c0_34, %c0_35], %160 {strides = array<i32>} : memref<16x128xf32, #tpu.memory_space<vmem>>, vector<16x128xf32>,
    return
  }
  func.func @transform_0(%arg0: i32) -> (i32, i32) {
    %c0_i32 = arith.constant 0 : i32
    %c0_i32_0 = arith.constant 0 : i32
    return %arg0, %c0_i32 : i32, i32
  }
  func.func @transform_1(%arg0: i32) -> (i32, i32) {
    %c0_i32 = arith.constant 0 : i32
    %c0_i32_0 = arith.constant 0 : i32
    return %arg0, %c0_i32 : i32, i32
  }
  func.func @transform_2(%arg0: i32) -> (i32, i32) {
    %c0_i32 = arith.constant 0 : i32
    %c0_i32_0 = arith.constant 0 : i32
    %c0_i32_1 = arith.constant 0 : i32
    return %c0_i32, %c0_i32_0 : i32, i32
  }
  func.func @transform_3(%arg0: i32) -> (i32, i32) {
    %c0_i32 = arith.constant 0 : i32
    %c0_i32_0 = arith.constant 0 : i32
    %c0_i32_1 = arith.constant 0 : i32
    return %c0_i32, %c0_i32_0 : i32, i32
  }
  func.func @transform_4(%arg0: i32) -> (i32, i32) {
    %c0_i32 = arith.constant 0 : i32
    %c0_i32_0 = arith.constant 0 : i32
    return %arg0, %c0_i32 : i32, i32
  }
}

</mosaic_0001>

<bundles_post_ra>
// kernel: tpu_custom_call.1
= control target key start
LH: loop header
LB: loop body
LE: loop exit
PB: predicated region body
PF: predicated region fallthrough
CT: control target
= control target key end

     0   :  { %9 = vsyncpa [#allocation3], 0  ;;  %s617_s0 = inlined_call_operand.vmem [shape: f32[16,32], index: 0, kind: input, shape index: {}]   ;;  %s618_s1 = inlined_call_operand.vmem [shape: f32[16,4], index: 1, kind: input, shape index: {}]   ;;  %s619_s2 = inlined_call_operand.hbm [shape: f32[32,128], index: 2, kind: input, shape index: {}]   ;;  %s620_s3 = inlined_call_operand.vmem [shape: f32[4,128], index: 3, kind: input, shape index: {}]   ;;  %s621_s4 = inlined_call_operand.hbm [shape: f32[16,128], index: 4, kind: output, shape index: {}]  }
   0x1   :  { %10 = vsyncpa [#allocation4], 0  ;;  %s19_s17 = sshll.u32 %s619_s2, 4  ;;  %s468_s18 = smov [#allocation2]   ;;  %s20_s17 = int_to_ptr.hbm [resolvable:$true] %s19_s17 }
   0x2   :  { %s21_s19 = sshll.u32 %s468_s18, 4  ;;  %s469_s20 = smov 128   ;;  %s22_s19 = int_to_ptr.vmem [resolvable:$true] %s21_s19 }
   0x3   :  { %s470_s21 = smov 8  }
   0x4   :  { %27 = dma.hbm_to_vmem [thread:$0]  %s20_s17, 512, %s22_s19, [#allocation3], %s469_s20, %s469_s20, %s470_s21  }
   0x5   :  { %464 = dma.done.wait [#allocation3], 512  }
   0x6   :  { %465 = vsyncadd [#allocation3], 4294966784  ;;  %v471_v0 = vmov 0   ;;  %v515_v1 = vld [vmem:[%s618_s1] sm:$0xff]  ;;  %s472_s23 = smov 126   ;;  %v522_v3 = vld [vmem:[%s618_s1 + $0x8] sm:$0xff] }
   0x7   :  { %380 = vset.pattern.permute.xlu1 %v471_v0  ;;  %386 = vset.pattern.permute.xlu0 %v471_v0  ;;  %v185_v2 = vmul.f32 0.5, %v515_v1  ;;  %v186_v4 = vmul.f32 0.5, %v522_v3  ;;  %v473_v5 = vmov 1   ;;  %v39_v6 = vld [vmem:[%s617_s0 + $0x8] sm:$0xff]  ;;  %s474_s1 = smov 127   ;;  %v37_v24 = vld [vmem:[#allocation2 + $0x18] sm:$0xff] }
   0x8   :  { %381 = vset.pattern.permute.xlu2 %v471_v0  ;;  %97 = vperm.xlu1 %380, %v515_v1   ;;  %v41_v7 = vand.u32 2147483647, %v39_v6  ;;  %vm59_vm0 = vcmp.ge.f32.partialorder %v39_v6, 0.0  ;;  %v65_v26 = vsub.f32 0.0, %v39_v6  ;;  %v475_v32 = vmov 2   ;;  %v36_v36 = vld [vmem:[#allocation2 + $0x10] sm:$0xff] }
   0x9   :  { %189 = vrot.lane.b32.xlu0 %v185_v2, %s472_s23  ;;  %366 = vmatpush.msra.mxu1 %v37_v24  ;;  %v35_v40 = vld [vmem:[#allocation2 + $0x8] sm:$0xff]  ;;  %v38_v41 = vld [vmem:[%s617_s0] sm:$0xff]  ;;  %vm155_vm1 = vcmask 261120   ;;  %v476_v49 = vmov 3   ;;  %s351_s8 = sshll.u32 %s621_s4, 4  ;;  %s352_s8 = int_to_ptr.hbm [resolvable:$true] %s351_s8 }
   0xa   :  { %v43_v8 = vsub.f32 0.0, %v41_v7  ;;  %174 = vmatpush.msra.mxu0 %v37_v24  ;;  %v67_v29 = vmax.f32 %v65_v26, 0.0  ;;  %v34_v42 = vld [vmem:[#allocation2] sm:$0xff]  ;;  %v40_v45 = vand.u32 2147483647, %v38_v41  ;;  %v64_v52 = vsub.f32 0.0, %v38_v41 }
   0xb   :  { %367 = vmatpush.msra.mxu1 %v36_v36  ;;  %vm58_vm2 = vcmp.ge.f32.partialorder %v38_v41, 0.0 }
   0xc   :  { %v46_v9 = vmul.f32 1.442695, %v43_v8  ;;  %175 = vmatpush.msra.mxu0 %v36_v36  ;;  %v42_v47 = vsub.f32 0.0, %v40_v45  ;;  %v66_v56 = vmax.f32 %v64_v52, 0.0 }
   0xd   :  { %368 = vmatpush.msra.mxu1 %v35_v40 }
   0xe   :  { %396 = vpow2.f32 %v46_v9  ;;  %176 = vmatpush.msra.mxu0 %v35_v40  ;;  %v44_v48 = vmul.f32 1.442695, %v42_v47 }
   0xf   :  { %369 = vmatpush.msra.mxu1 %v34_v42 }
  0x10   :  { %382 = vset.pattern.permute.xlu1 %v473_v5  ;;  %177 = vmatpush.msra.mxu0 %v34_v42 }
  0x11   :  { %191 = vrot.lane.b32.xlu0 %v186_v4, %s472_s23 }
  0x14   :  { %v397_v10 = vpop.eup %396 }
  0x15   :  { %v49_v14 = vadd.f32 1.0, %v397_v10 }
  0x17   :  { %398 = vrcp.f32 %v49_v14 }
  0x18   :  { %400 = vlog2.f32 %v49_v14 }
  0x19   :  { %402 = vpow2.f32 %v44_v48 }
  0x1d   :  { %v399_v17 = vpop.eup %398 }
  0x1e   :  { %v53_v20 = vmul.f32 %v399_v17, %v49_v14  ;;  %v401_v27 = vpop.eup %400 }
  0x1f   :  { %v71_v30 = vmul.f32 0.6931472, %v401_v27  ;;  %v403_v50 = vpop.eup %402 }
  0x20   :  { %v55_v22 = vsub.f32 2.0, %v53_v20  ;;  %v48_v51 = vadd.f32 1.0, %v403_v50  ;;  %v589_v20 = vld [vmem:[%s620_s3] sm:$0xf]  ;;  %s477_s3 = smov [#allocation5]  }
  0x21   :  { %v73_v33 = vadd.f32 %v71_v30, %v67_v29  ;;  %s349_s5 = sshll.u32 %s477_s3, 4  ;;  %s350_s5 = int_to_ptr.vmem [resolvable:$true] %s349_s5 }
  0x22   :  { %v57_v23 = vmul.f32 %v399_v17, %v55_v22  ;;  %404 = vrcp.f32 %v48_v51  ;;  %v199_v22 = vmul.f32 0.5, %v589_v20 }
  0x23   :  { %v75_v37 = vadd.f32 %v73_v33, %v39_v6  ;;  %406 = vlog2.f32 %v48_v51 }
  0x24   :  { %v61_v25 = vmul.f32 %v397_v10, %v57_v23 }
  0x26   :  { %v63_v28 = vsel %vm59_vm0, %v57_v23, %v61_v25 }
  0x27   :  { %v77_v31 = vsub.f32 1.0, %v63_v28  ;;  %v85_v35 = vmul.f32 %v63_v28, %v63_v28 }
  0x28   :  { %v405_v53 = vpop.eup %404 }
  0x29   :  { %v79_v34 = vmul.f32 %v77_v31, %v77_v31  ;;  %v87_v39 = vmul.f32 0.75, %v85_v35  ;;  %v407_v54 = vpop.eup %406  ;;  %v52_v55 = vmul.f32 %v405_v53, %v48_v51 }
  0x2a   :  { %v69_v57 = vmul.f32 0.6931472, %v407_v54 }
  0x2b   :  { %v81_v38 = vmul.f32 0.25, %v79_v34  ;;  %v89_v44 = vmul.f32 %v87_v39, %v75_v37  ;;  %v54_v58 = vsub.f32 2.0, %v52_v55 }
  0x2c   :  { %v72_v60 = vadd.f32 %v69_v57, %v66_v56 }
  0x2d   :  { %v83_v43 = vmul.f32 %v81_v38, %v73_v33  ;;  %v56_v59 = vmul.f32 %v405_v53, %v54_v58 }
  0x2e   :  { %v74_v63 = vadd.f32 %v72_v60, %v38_v41 }
  0x2f   :  { %v91_v46 = vsub.f32 %v83_v43, %v89_v44  ;;  %v60_v61 = vmul.f32 %v403_v50, %v56_v59 }
  0x31   :  { %365 = vmatmul.msk.f32.vlgmr.msra.gmra.mxu1 %vm155_vm1, %v91_v46  ;;  %v62_v62 = vsel %vm58_vm2, %v56_v59, %v60_v61 }
  0x32   :  { %v76_v2 = vsub.f32 1.0, %v62_v62 }
  0x34   :  { %v78_v4 = vmul.f32 %v76_v2, %v76_v2 }
  0x36   :  { %v80_v7 = vmul.f32 0.25, %v78_v4 }
  0x38   :  { %v82_v9 = vmul.f32 %v80_v7, %v72_v60 }
  0x7b   :  { %v190_v11 = vpop.permute.xlu0 %189 }
  0x7c   :  { %v195_v12 = vsub.f32 %v515_v1, %v190_v11  ;;  %v531_v13 = vadd.f32 %v190_v11, %v515_v1 }
  0x7e   :  { %v534_v15 = vsub.f32 %v531_v13, %v195_v12 }
  0x80   :  { %209 = vrot.lane.b32.xlu1 %v534_v15, %s474_s1 }
  0x83   :  { %v192_v16 = vpop.permute.xlu0 %191 }
  0x84   :  { %v538_v18 = vsub.f32 %v522_v3, %v192_v16  ;;  %v541_v19 = vadd.f32 %v192_v16, %v522_v3 }
  0x86   :  { %229 = vperm.xlu0 %386, %v541_v19   ;;  %v546_v21 = vsub.f32 %v541_v19, %v538_v18 }
  0x88   :  { %115 = vperm.xlu1 %382, %v522_v3   ;;  %211 = vrot.lane.b32.xlu2 %v546_v21, %s474_s1 }
  0x8e   :  { %387 = vset.pattern.permute.xlu0 %v473_v5 }
  0x8f   :  { %111 = vperm.xlu0 %387, %v515_v1  }
  0x90   :  { %384 = vset.pattern.permute.xlu1 %v475_v32  ;;  %102 = vperm.xlu2 %381, %v522_v3  }
  0x91   :  { %130 = vperm.xlu1 %384, %v522_v3  }
  0x97   :  { %264 = vperm.xlu0 %387, %v195_v12  }
  0x98   :  { %383 = vset.pattern.permute.xlu2 %v475_v32 }
  0x99   :  { %388 = vset.pattern.permute.xlu1 %v471_v0  ;;  %126 = vperm.xlu2 %383, %v515_v1  }
  0x9a   :  { %237 = vperm.xlu1 %388, %v195_v12   ;;  %v574_v12 = vpop.permute.xlu1 %97 }
  0x9f   :  { %394 = vset.pattern.permute.xlu0 %v476_v49 }
  0xa0   :  { %145 = vperm.xlu0 %394, %v522_v3   ;;  %v84_v3 = vmul.f32 %v62_v62, %v62_v62 }
  0xa1   :  { %385 = vset.pattern.permute.xlu2 %v471_v0 }
  0xa2   :  { %389 = vset.pattern.permute.xlu1 %v473_v5  ;;  %224 = vperm.xlu2 %385, %v531_v13   ;;  %v86_v6 = vmul.f32 0.75, %v84_v3 }
  0xa3   :  { %253 = vperm.xlu1 %389, %v531_v13  }
  0xa4   :  { %v88_v8 = vmul.f32 %v86_v6, %v74_v63 }
  0xa6   :  { %v90_v10 = vsub.f32 %v82_v9, %v88_v8  ;;  %v118_v8 = vperm.slane %v589_v20, 1 }
  0xa8   :  { %395 = vset.pattern.permute.xlu0 %v471_v0  ;;  %364 = vmatmul.msk.f32.vlgmr.msra.gmra.mxu0 %vm155_vm1, %v90_v10 }
  0xaa   :  { %242 = vperm.xlu2 %385, %v538_v18  }
  0xab   :  { %268 = vperm.xlu1 %389, %v538_v18  }
  0xb2   :  { %390 = vset.pattern.permute.xlu2 %v473_v5 }
  0xb3   :  { %257 = vperm.xlu2 %390, %v541_v19   ;;  %392 = vset.pattern.permute.xlu1 %v471_v0 }
  0xbb   :  { %391 = vset.pattern.permute.xlu2 %v471_v0 }
  0xe2   :  { %v212_v11 = vpop.permute.xlu2 %211 }
  0xe3   :  { %v216_v5 = vmul.f32 %v212_v11, %v546_v21 }
  0xe5   :  { %287 = vperm.xlu1 %392, %v216_v5  }
  0xea   :  { %v580_v17 = vpop.permute.xlu2 %102 }
  0xf2   :  { %v210_v13 = vpop.permute.xlu1 %209 }
  0xf3   :  { %v215_v14 = vmul.f32 %v210_v13, %v534_v15  ;;  %v584_v18 = vpop.permute.xlu2 %126 }
  0xf5   :  { %282 = vperm.xlu2 %391, %v215_v14   ;;  %v105_v14 = vperm.slane %v589_v20, 0 }
  0xf8   :  { %v230_v19 = vpop.permute.xlu0 %229 }
  0xfa   :  { %v578_v16 = vpop.permute.xlu1 %115 }
  0xfc   :  { %v225_v15 = vpop.permute.xlu2 %224 }
  0xfd   :  { %393 = vset.pattern.permute.xlu2 %v476_v49 }
  0xfe   :  { %141 = vperm.xlu2 %393, %v515_v1   ;;  %v201_v1 = vrot.slane %v199_v22, 2  ;;  %v133_v22 = vperm.slane %v589_v20, 2 }
 0x100   :  { %v204_v25 = vadd.f32 %v201_v1, %v589_v20  ;;  %v203_v26 = vsub.f32 %v589_v20, %v201_v1 }
 0x101   :  { %v112_v23 = vpop.permute.xlu0 %111 }
 0x102   :  { %v271_v28 = vperm.slane %v203_v26, 1  ;;  %v260_v29 = vperm.slane %v204_v25, 1  ;;  %v245_v31 = vperm.slane %v203_v26, 0  ;;  %v232_v33 = vperm.slane %v204_v25, 0 }
 0x103   :  { %v582_v0 = vpop.permute.xlu1 %130  ;;  %v217_v38 = vsub.f32 %v204_v25, %v203_v26  ;;  %v119_v1 = vsub.f32 %v112_v23, %v118_v8  ;;  %v106_v26 = vsub.f32 %v574_v12, %v105_v14 }
 0x104   :  { %v243_v27 = vpop.permute.xlu2 %242  ;;  %v307_v36 = vmax.f32 %v225_v15, %v232_v33  ;;  %v233_v51 = vmin.f32 %v225_v15, %v232_v33  ;;  %v308_v53 = vmax.f32 %v230_v19, %v232_v33  ;;  %v234_v7 = vmin.f32 %v230_v19, %v232_v33 }
 0x105   :  { %v219_v45 = vrot.slane %v217_v38, 1  ;;  %v310_v48 = vmin.f32 %v243_v27, %v245_v31  ;;  %v247_v3 = vmax.f32 %v243_v27, %v245_v31 }
 0x107   :  { %v221_v56 = vmul.f32 %v219_v45, %v217_v38  ;;  %v312_v58 = vsub.f32 %v308_v53, %v310_v48 }
 0x109   :  { %v265_v30 = vpop.permute.xlu0 %264  ;;  %v290_v63 = vperm.slane %v221_v56, 0  ;;  %v314_v4 = vmax.f32 %v312_v58, 0.0 }
 0x10a   :  { %v317_v34 = vmin.f32 %v265_v30, %v271_v28  ;;  %v272_v46 = vmax.f32 %v265_v30, %v271_v28  ;;  %v134_v30 = vsub.f32 %v584_v18, %v133_v22  ;;  %v135_v18 = vsub.f32 %v582_v0, %v133_v22 }
 0x10c   :  { %v238_v21 = vpop.permute.xlu1 %237 }
 0x10d   :  { %v309_v35 = vmin.f32 %v238_v21, %v245_v31  ;;  %v258_v41 = vpop.permute.xlu2 %257  ;;  %v246_v47 = vmax.f32 %v238_v21, %v245_v31  ;;  %v249_v21 = vsub.f32 %v234_v7, %v247_v3  ;;  %v121_v31 = vand.u32 2147483647, %v119_v1 }
 0x10e   :  { %v316_v50 = vmax.f32 %v258_v41, %v260_v29  ;;  %v262_v6 = vmin.f32 %v258_v41, %v260_v29 }
 0x10f   :  { %v311_v40 = vsub.f32 %v307_v36, %v309_v35  ;;  %v248_v57 = vsub.f32 %v233_v51, %v246_v47 }
 0x111   :  { %v313_v49 = vmax.f32 %v311_v40, 0.0  ;;  %v250_v2 = vmax.f32 %v248_v57, 0.0  ;;  %v136_v40 = vand.u32 2147483647, %v134_v30 }
 0x115   :  { %v254_v24 = vpop.permute.xlu1 %253 }
 0x116   :  { %v315_v32 = vmax.f32 %v254_v24, %v260_v29  ;;  %v261_v42 = vmin.f32 %v254_v24, %v260_v29  ;;  %v107_v29 = vsub.f32 %v580_v17, %v105_v14  ;;  %v182_v14 = vpop.f32.mrf.mxu1 }
 0x118   :  { %v319_v37 = vsub.f32 %v315_v32, %v317_v34  ;;  %v274_v52 = vsub.f32 %v261_v42, %v272_v46  ;;  %v148_v32 = vperm.slane %v589_v20, 3  ;;  %v120_v34 = vsub.f32 %v578_v16, %v118_v8  ;;  %v146_v20 = vpop.permute.xlu0 %145 }
 0x119   :  { %v109_v17 = vand.u32 2147483647, %v107_v29 }
 0x11a   :  { %v321_v43 = vmax.f32 %v319_v37, 0.0  ;;  %v276_v59 = vmax.f32 %v274_v52, 0.0  ;;  %v108_v37 = vand.u32 2147483647, %v106_v26  ;;  %v137_v52 = vand.u32 2147483647, %v135_v18 }
 0x11b   :  { %v150_v53 = vsub.f32 %v146_v20, %v148_v32 }
 0x11c   :  { %v594_v54 = vmul.f32 %v321_v43, %v313_v49  ;;  %v278_v9 = vmul.f32 %v276_v59, %v250_v2  ;;  %v123_v41 = vadd.f32 %v121_v31, %v108_v37  ;;  %v122_v43 = vand.u32 2147483647, %v120_v34 }
 0x11d   :  { %v269_v39 = vpop.permute.xlu1 %268 }
 0x11e   :  { %v318_v44 = vmin.f32 %v269_v39, %v271_v28  ;;  %v327_v60 = vmax.f32 %v594_v54, 1e-07  ;;  %v273_v61 = vmax.f32 %v269_v39, %v271_v28  ;;  %v251_v28 = vmax.f32 %v249_v21, 0.0 }
 0x11f   :  { %v124_v51 = vadd.f32 %v122_v43, %v109_v17 }
 0x120   :  { %v320_v55 = vsub.f32 %v316_v50, %v318_v44  ;;  %408 = vrcp.f32 %v327_v60  ;;  %v275_v11 = vsub.f32 %v262_v6, %v273_v61  ;;  %v138_v50 = vadd.f32 %v136_v40, %v123_v41 }
 0x122   :  { %v322_v62 = vmax.f32 %v320_v55, 0.0  ;;  %v277_v24 = vmax.f32 %v275_v11, 0.0 }
 0x124   :  { %v598_v5 = vmul.f32 %v322_v62, %v314_v4  ;;  %v279_v23 = vmul.f32 %v277_v24, %v251_v28  ;;  %v139_v62 = vadd.f32 %v137_v52, %v124_v51 }
 0x125   :  { %v179_v59 = vpop.f32.mrf.mxu0 }
 0x126   :  { %v328_v25 = vmax.f32 %v598_v5, 1e-07  ;;  %v409_v27 = vpop.eup %408 }
 0x127   :  { %v331_v38 = vmul.f32 %v409_v27, %v327_v60 }
 0x129   :  { %v333_v16 = vsub.f32 2.0, %v331_v38 }
 0x12b   :  { %v335_v58 = vmul.f32 %v409_v27, %v333_v16 }
 0x14f   :  { %v283_v10 = vpop.permute.xlu2 %282 }
 0x150   :  { %v291_v13 = vadd.f32 %v290_v63, %v283_v10 }
 0x152   :  { %v293_v15 = vsub.f32 %v291_v13, %v278_v9 }
 0x154   :  { %v295_v19 = vmax.f32 %v293_v15, 1e-07  ;;  %v325_v49 = vsub.f32 %v594_v54, %v293_v15 }
 0x156   :  { %410 = vrcp.f32 %v295_v19  ;;  %v337_v60 = vmul.f32 %v335_v58, %v325_v49 }
 0x157   :  { %v288_v33 = vpop.permute.xlu1 %287  ;;  %412 = vrcp.f32 %v328_v25 }
 0x158   :  { %v292_v35 = vadd.f32 %v290_v63, %v288_v33  ;;  %v142_v36 = vpop.permute.xlu2 %141  ;;  %v152_v63 = vand.u32 2147483647, %v150_v53 }
 0x159   :  { %v149_v12 = vsub.f32 %v142_v36, %v148_v32 }
 0x15a   :  { %v294_v39 = vsub.f32 %v292_v35, %v279_v23  ;;  %v154_v10 = vadd.f32 %v152_v63, %v139_v62 }
 0x15b   :  { %v151_v46 = vand.u32 2147483647, %v149_v12 }
 0x15c   :  { %v411_v42 = vpop.eup %410  ;;  %v296_v44 = vmax.f32 %v294_v39, 1e-07  ;;  %v326_v54 = vsub.f32 %v598_v5, %v294_v39 }
 0x15d   :  { %v299_v45 = vmul.f32 %v411_v42, %v295_v19  ;;  %v413_v47 = vpop.eup %412  ;;  %v153_v56 = vadd.f32 %v151_v46, %v138_v50 }
 0x15e   :  { %414 = vrcp.f32 %v296_v44  ;;  %v332_v55 = vmul.f32 %v413_v47, %v328_v25 }
 0x15f   :  { %v301_v48 = vsub.f32 2.0, %v299_v45  ;;  %v180_v4 = vadd.f32 %v179_v59, %v153_v56 }
 0x160   :  { %v334_v3 = vsub.f32 2.0, %v332_v55 }
 0x161   :  { %v303_v57 = vmul.f32 %v411_v42, %v301_v48 }
 0x162   :  { %v336_v13 = vmul.f32 %v413_v47, %v334_v3 }
 0x163   :  { %v305_v0 = vmul.f32 %v303_v57, %v278_v9  ;;  %v183_v9 = vadd.f32 %v182_v14, %v154_v10 }
 0x164   :  { %v415_v61 = vpop.eup %414  ;;  %v338_v15 = vmul.f32 %v336_v13, %v326_v54 }
 0x165   :  { %v300_v2 = vmul.f32 %v415_v61, %v296_v44  ;;  %v339_v6 = vsub.f32 %v305_v0, %v337_v60 }
 0x167   :  { %v302_v7 = vsub.f32 2.0, %v300_v2  ;;  %v341_v8 = vsub.f32 %v180_v4, %v339_v6 }
 0x169   :  { %v304_v11 = vmul.f32 %v415_v61, %v302_v7  ;;  %343 = vst [vmem:[#allocation5] sm:$0xff] %v341_v8 }
 0x16b   :  { %v306_v21 = vmul.f32 %v304_v11, %v279_v23 }
 0x16d   :  { %v340_v22 = vsub.f32 %v306_v21, %v338_v15 }
 0x16f   :  { %v342_v1 = vsub.f32 %v183_v9, %v340_v22 }
 0x171   :  { %344 = vst [vmem:[#allocation5 + $0x8] sm:$0xff] %v342_v1 }
 0x172   :  { %357 = dma.vmem_to_hbm [thread:$0]  %s350_s5, 256, %s352_s8, [#allocation4], %s469_s20, %s469_s20, %s470_s21  }
 0x173   :  { %466 = dma.done.wait [#allocation4], 256  }
 0x174   :  { %467 = vsyncadd [#allocation4], 4294967040 }
 0x175   :  { %362 = vsyncpa [#allocation3], 1 }
 0x176   :  { %363 = vsyncpa [#allocation4], 1 }

</bundles_post_ra>
